<compile_context>
chip_gen: v7x
topology: tpu7x:2x2x1
jax: 0.10.0
libtpu: 0.0.40
codegen_flags: <defaults>
</compile_context>

<pallas_src>
import jax
import jax.numpy as jnp
from jax.experimental import pallas as pl
from jax.experimental.pallas import tpu as pltpu


def classifier_kernel(x_ref, w1_ref, b1_ref, w2_ref, b2_ref, w3_ref, b3_ref,
                      o_ref):
    # x_ref: (bm, D) f32 tile of embeddings (batch rows on sublanes).
    # Cast to bf16 in-kernel; the VPU cast hides under MXU slack.
    x = x_ref[...].astype(jnp.bfloat16)

    # Linear(D, 512) + ReLU    (Dropout(0.3) -> identity at inference)
    h1 = jnp.dot(x, w1_ref[...], preferred_element_type=jnp.float32)
    h1 = jnp.maximum(h1 + b1_ref[...], 0.0)

    # Linear(512, 256) + ReLU  (Dropout(0.3) -> identity at inference)
    h2 = jnp.dot(h1.astype(jnp.bfloat16), w2_ref[...],
                 preferred_element_type=jnp.float32)
    h2 = jnp.maximum(h2 + b2_ref[...], 0.0)

    # Linear(256, 1) as a lane reduction (keeps the MXU free; output is 1-wide)
    logit = jnp.sum(h2 * w3_ref[...], axis=-1) + b3_ref[0]   # (bm,)

    # Sigmoid: exp on EUP + approximate reciprocal on EUP (no VPU divide).
    denom = 1.0 + jnp.exp(-logit)
    # Lane-dense store: batch on lanes.
    o_ref[...] = pl.reciprocal(denom.reshape(1, -1), approx=True)


def _round_up(x, m):
    return (x + m - 1) // m * m


def prepare_classifier_params(params):
    """One-time parameter prep, hoisted out of the per-call wrapper.

    bf16 weight casts and layout reshapes happen at load time, not per
    forward call (saves ~640 KiB of HBM re-cast traffic + launches per call).
    """
    w1, b1, w2, b2, w3, b3 = params
    return (
        w1.astype(jnp.bfloat16),                   # (D, 512)   MXU operand
        b1.reshape(1, -1).astype(jnp.float32),     # (1, 512)
        w2.astype(jnp.bfloat16),                   # (512, 256) MXU operand
        b2.reshape(1, -1).astype(jnp.float32),     # (1, 256)
        w3.reshape(1, -1).astype(jnp.float32),     # (1, 256)   VPU row
        b3.reshape(1).astype(jnp.float32),         # (1,)       SMEM scalar
    )


def attack_classifier_forward(embeddings, prepared_params, *, block_m=512):
    """Pallas forward pass of the binary classifier head.

    embeddings:      [B, D] float32 (pre-computed sentence embeddings)
    prepared_params: output of prepare_classifier_params
    returns:         [B] float32 probabilities (matches .squeeze() in PyTorch)
    """
    w1_bf, b1, w2_bf, b2, w3_row, b3_s = prepared_params
    B, D = embeddings.shape
    H1 = w1_bf.shape[1]   # 512
    H2 = w2_bf.shape[1]   # 256

    # Batch tile selection.
    if B <= 64:
        # Tiny batch: single grid step; output block == full array so the
        # 128-lane rule does not bind.  Avoids 8-16x wasted MXU rows.
        bm = _round_up(max(B, 1), 16)
    else:
        bm = max(128, _round_up(block_m, 128))
        B_ceil = _round_up(B, 128)
        bm = min(bm, B_ceil)
        if B_ceil >= 256:
            # Guarantee >= 2 grid steps along the "parallel" batch axis so a
            # v7x megacore can shard it across both TensorCores.
            bm = min(bm, _round_up(pl.cdiv(B_ceil, 2), 128))

    num_blocks = pl.cdiv(B, bm)
    B_out = num_blocks * bm   # lane-dense output width; no input padding needed

    out = pl.pallas_call(
        classifier_kernel,
        out_shape=jax.ShapeDtypeStruct((1, B_out), jnp.float32),
        grid_spec=pltpu.PrefetchScalarGridSpec(
            num_scalar_prefetch=0,
            grid=(num_blocks,),
            in_specs=[
                pl.BlockSpec((bm, D), lambda i: (i, 0)),     # embeddings tile (f32)
                pl.BlockSpec((D, H1), lambda i: (0, 0)),     # W1 bf16 (resident)
                pl.BlockSpec((1, H1), lambda i: (0, 0)),     # b1
                pl.BlockSpec((H1, H2), lambda i: (0, 0)),    # W2 bf16 (resident)
                pl.BlockSpec((1, H2), lambda i: (0, 0)),     # b2
                pl.BlockSpec((1, H2), lambda i: (0, 0)),     # w3 row
                pl.BlockSpec(memory_space=pltpu.MemorySpace.SMEM),  # b3 scalar
            ],
            out_specs=pl.BlockSpec((1, bm), lambda i: (0, i)),
        ),
        compiler_params=pltpu.CompilerParams(
            dimension_semantics=("parallel",),
            vmem_limit_bytes=32 * 1024 * 1024),
    )(embeddings, w1_bf, b1, w2_bf, b2, w3_row, b3_s)

    # PyTorch: outputs.squeeze() -> shape [B].  (Ragged last tile's garbage
    # lanes are discarded here.)
    return out[0, :B]


def init_params(key, embedding_dim):
    """Deterministic synthetic parameters (PyTorch nn.Linear-style uniform)."""
    dims = [(embedding_dim, 512), (512, 256), (256, 1)]
    params = []
    for (fan_in, fan_out) in dims:
        key, kw, kb = jax.random.split(key, 3)
        bound = 1.0 / jnp.sqrt(jnp.float32(fan_in))
        w = jax.random.uniform(kw, (fan_in, fan_out), jnp.float32,
                               minval=-bound, maxval=bound)
        b = jax.random.uniform(kb, (1, fan_out), jnp.float32,
                               minval=-bound, maxval=bound)
        params.extend([w, b])
    return tuple(params)


def reference_forward(embeddings, params):
    """Pure-JAX reference using the same bf16-matmul / f32-accumulate recipe."""
    w1, b1, w2, b2, w3, b3 = params
    x = embeddings.astype(jnp.bfloat16)
    h1 = jnp.dot(x, w1.astype(jnp.bfloat16),
                 preferred_element_type=jnp.float32)
    h1 = jnp.maximum(h1 + b1, 0.0)
    h2 = jnp.dot(h1.astype(jnp.bfloat16), w2.astype(jnp.bfloat16),
                 preferred_element_type=jnp.float32)
    h2 = jnp.maximum(h2 + b2, 0.0)
    logit = h2 @ w3 + b3
    return jax.nn.sigmoid(logit)[:, 0]


if __name__ == "__main__":
    B = 8      # batch of "texts"
    D = 384    # sentence-embedding dim (e.g. all-MiniLM-L6-v2)

    key = jax.random.PRNGKey(0)
    key, k_emb = jax.random.split(key)
    embeddings = jax.random.normal(k_emb, (B, D), jnp.float32)

    params = init_params(key, D)
    prepared = prepare_classifier_params(params)   # hoisted one-time weight prep

    out = attack_classifier_forward(embeddings, prepared)
    out = jax.block_until_ready(out)

    ref = reference_forward(embeddings, params)
    assert out.shape == (B,)
    assert jnp.allclose(out, ref, atol=3e-3, rtol=3e-3), (out, ref)

    print("KERNEL_OK")
</pallas_src>

<mosaic_0001>
module attributes {stable_mosaic.version = 11 : i64} {
  func.func @classifier_kernel(%arg0: i32, %arg1: memref<16x384xf32, #tpu.memory_space<vmem>>, %arg2: memref<384x512xbf16, #tpu.memory_space<vmem>>, %arg3: memref<1x512xf32, #tpu.memory_space<vmem>>, %arg4: memref<512x256xbf16, #tpu.memory_space<vmem>>, %arg5: memref<1x256xf32, #tpu.memory_space<vmem>>, %arg6: memref<1x256xf32, #tpu.memory_space<vmem>>, %arg7: memref<1xf32, #tpu.memory_space<smem>>, %arg8: memref<1x16xf32, #tpu.memory_space<vmem>>) attributes {dimension_semantics = [#tpu.dimension_semantics<parallel>], iteration_bounds = array<i64: 1>, scalar_prefetch = 0 : i64, scratch_operands = 0 : i64, tpu.core_type = #tpu.core_type<tc>, window_params = [{transform_indices = @transform_0, window_bounds = array<i64: 16, 384>}, {pipeline_mode = #tpu.pipeline_mode<synchronous>, transform_indices = @transform_1, window_bounds = array<i64: 384, 512>}, {pipeline_mode = #tpu.pipeline_mode<synchronous>, transform_indices = @transform_2, window_bounds = array<i64: 1, 512>}, {pipeline_mode = #tpu.pipeline_mode<synchronous>, transform_indices = @transform_3, window_bounds = array<i64: 512, 256>}, {pipeline_mode = #tpu.pipeline_mode<synchronous>, transform_indices = @transform_4, window_bounds = array<i64: 1, 256>}, {pipeline_mode = #tpu.pipeline_mode<synchronous>, transform_indices = @transform_5, window_bounds = array<i64: 1, 256>}, {transform_indices = @transform_6, window_bounds = array<i64: 1>}, {transform_indices = @transform_7, window_bounds = array<i64: 1, 16>}]} {
    %c0 = arith.constant 0 : index
    %c0_0 = arith.constant 0 : index
    %0 = vector.load %arg1[%c0, %c0_0] : memref<16x384xf32, #tpu.memory_space<vmem>>, vector<16x384xf32>
    %1 = arith.truncf %0 : vector<16x384xf32> to vector<16x384xbf16>
    %c0_1 = arith.constant 0 : index
    %c0_2 = arith.constant 0 : index
    %2 = vector.load %arg2[%c0_1, %c0_2] : memref<384x512xbf16, #tpu.memory_space<vmem>>, vector<384x512xbf16>
    %cst = arith.constant dense<0.000000e+00> : vector<16x512xf32>
    %3 = tpu.matmul %1, %2, %cst {dimension_numbers = #tpu.dot_dimension_numbers<[1], [0], [0], [1], [0, 0, 1, 1], [], []>} : vector<16x384xbf16>, vector<384x512xbf16>, vector<16x512xf32> -> vector<16x512xf32>
    %c0_3 = arith.constant 0 : index
    %c0_4 = arith.constant 0 : index
    %4 = vector.load %arg3[%c0_3, %c0_4] : memref<1x512xf32, #tpu.memory_space<vmem>>, vector<1x512xf32>
    %5 = vector.broadcast %4 : vector<1x512xf32> to vector<16x512xf32>
    %6 = arith.addf %3, %5 : vector<16x512xf32>
    %cst_5 = arith.constant 0.000000e+00 : f32
    %7 = vector.broadcast %cst_5 : f32 to vector<16x512xf32>
    %8 = arith.maximumf %6, %7 : vector<16x512xf32>
    %9 = arith.truncf %8 : vector<16x512xf32> to vector<16x512xbf16>
    %c0_6 = arith.constant 0 : index
    %c0_7 = arith.constant 0 : index
    %10 = vector.load %arg4[%c0_6, %c0_7] : memref<512x256xbf16, #tpu.memory_space<vmem>>, vector<512x256xbf16>
    %cst_8 = arith.constant dense<0.000000e+00> : vector<16x256xf32>
    %11 = tpu.matmul %9, %10, %cst_8 {dimension_numbers = #tpu.dot_dimension_numbers<[1], [0], [0], [1], [0, 0, 1, 1], [], []>} : vector<16x512xbf16>, vector<512x256xbf16>, vector<16x256xf32> -> vector<16x256xf32>
    %c0_9 = arith.constant 0 : index
    %c0_10 = arith.constant 0 : index
    %12 = vector.load %arg5[%c0_9, %c0_10] : memref<1x256xf32, #tpu.memory_space<vmem>>, vector<1x256xf32>
    %13 = vector.broadcast %12 : vector<1x256xf32> to vector<16x256xf32>
    %14 = arith.addf %11, %13 : vector<16x256xf32>
    %cst_11 = arith.constant 0.000000e+00 : f32
    %15 = vector.broadcast %cst_11 : f32 to vector<16x256xf32>
    %16 = arith.maximumf %14, %15 : vector<16x256xf32>
    %c0_12 = arith.constant 0 : index
    %c0_13 = arith.constant 0 : index
    %17 = vector.load %arg6[%c0_12, %c0_13] : memref<1x256xf32, #tpu.memory_space<vmem>>, vector<1x256xf32>
    %18 = vector.broadcast %17 : vector<1x256xf32> to vector<16x256xf32>
    %19 = arith.mulf %16, %18 : vector<16x256xf32>
    %cst_14 = arith.constant dense<0.000000e+00> : vector<16xf32>
    %20 = vector.multi_reduction <add>, %19, %cst_14 [1] : vector<16x256xf32> to vector<16xf32>
    %c0_15 = arith.constant 0 : index
    %21 = memref.load %arg7[%c0_15] : memref<1xf32, #tpu.memory_space<smem>>
    %22 = vector.broadcast %21 : f32 to vector<16xf32>
    %23 = arith.addf %20, %22 : vector<16xf32>
    %cst_16 = arith.constant 0.000000e+00 : f32
    %24 = vector.broadcast %cst_16 : f32 to vector<16xf32>
    %25 = arith.subf %24, %23 : vector<16xf32>
    %26 = math.exp %25 : vector<16xf32>
    %cst_17 = arith.constant 1.000000e+00 : f32
    %27 = vector.broadcast %cst_17 : f32 to vector<16xf32>
    %28 = arith.addf %27, %26 : vector<16xf32>
    %29 = vector.shape_cast %28 : vector<16xf32> to vector<1x16xf32>
    %30 = tpu.reciprocal %29 {approx = true} : vector<1x16xf32> -> vector<1x16xf32>
    %c0_18 = arith.constant 0 : index
    %c0_19 = arith.constant 0 : index
    %31 = vector.load %arg8[%c0_18, %c0_19] : memref<1x16xf32, #tpu.memory_space<vmem>>, vector<1x16xf32>
    tpu.vector_store %arg8[%c0_18, %c0_19], %30 {strides = array<i32>} : memref<1x16xf32, #tpu.memory_space<vmem>>, vector<1x16xf32>,
    return
  }
  func.func @transform_0(%arg0: i32) -> (i32, i32) {
    %c0_i32 = arith.constant 0 : i32
    %c0_i32_0 = arith.constant 0 : i32
    return %arg0, %c0_i32 : i32, i32
  }
  func.func @transform_1(%arg0: i32) -> (i32, i32) {
    %c0_i32 = arith.constant 0 : i32
    %c0_i32_0 = arith.constant 0 : i32
    %c0_i32_1 = arith.constant 0 : i32
    return %c0_i32, %c0_i32_0 : i32, i32
  }
  func.func @transform_2(%arg0: i32) -> (i32, i32) {
    %c0_i32 = arith.constant 0 : i32
    %c0_i32_0 = arith.constant 0 : i32
    %c0_i32_1 = arith.constant 0 : i32
    return %c0_i32, %c0_i32_0 : i32, i32
  }
  func.func @transform_3(%arg0: i32) -> (i32, i32) {
    %c0_i32 = arith.constant 0 : i32
    %c0_i32_0 = arith.constant 0 : i32
    %c0_i32_1 = arith.constant 0 : i32
    return %c0_i32, %c0_i32_0 : i32, i32
  }
  func.func @transform_4(%arg0: i32) -> (i32, i32) {
    %c0_i32 = arith.constant 0 : i32
    %c0_i32_0 = arith.constant 0 : i32
    %c0_i32_1 = arith.constant 0 : i32
    return %c0_i32, %c0_i32_0 : i32, i32
  }
  func.func @transform_5(%arg0: i32) -> (i32, i32) {
    %c0_i32 = arith.constant 0 : i32
    %c0_i32_0 = arith.constant 0 : i32
    %c0_i32_1 = arith.constant 0 : i32
    return %c0_i32, %c0_i32_0 : i32, i32
  }
  func.func @transform_6(%arg0: i32) -> i32 {
    %c0_i32 = arith.constant 0 : i32
    %c0_i32_0 = arith.constant 0 : i32
    return %c0_i32 : i32
  }
  func.func @transform_7(%arg0: i32) -> (i32, i32) {
    %c0_i32 = arith.constant 0 : i32
    %c0_i32_0 = arith.constant 0 : i32
    return %c0_i32, %arg0 : i32, i32
  }
}

</mosaic_0001>

<bundles_post_ra>
// kernel: tpu_custom_call.1
= control target key start
LH: loop header
LB: loop body
LE: loop exit
PB: predicated region body
PF: predicated region fallthrough
CT: control target
= control target key end

     0   :  { %13 = vsyncpa [#allocation4], 0  ;;  %s2101_s0 = inlined_call_operand.hbm [shape: f32[8,384], index: 0, kind: input, shape index: {}]   ;;  %s2102_s1 = inlined_call_operand.hbm [shape: bf16[384,512], index: 1, kind: input, shape index: {}]   ;;  %s2103_s2 = inlined_call_operand.vmem [shape: f32[1,512], index: 2, kind: input, shape index: {}]   ;;  %s2104_s3 = inlined_call_operand.hbm [shape: bf16[512,256], index: 3, kind: input, shape index: {}]   ;;  %s2105_s4 = inlined_call_operand.vmem [shape: f32[1,256], index: 4, kind: input, shape index: {}]   ;;  %s2106_s5 = inlined_call_operand.vmem [shape: f32[1,256], index: 5, kind: input, shape index: {}]   ;;  %s2107_s6 = inlined_call_operand.<no memory space> [shape: f32[1], index: 6, kind: input, shape index: {}]   ;;  %s2108_s7 = inlined_call_operand.hbm [shape: f32[1,16], index: 7, kind: output, shape index: {}]  }
   0x1   :  { %14 = vsyncpa [#allocation7], 0 }
   0x2   :  { %15 = vsyncpa [#allocation5], 0 }
   0x3   :  { %20 = vsyncadd [#allocation4], 384  ;;  %s1954_s24 = smov [#allocation6]   ;;  %s1860_s28 = scalar_lea.hbm %s2102_s1, 12288 }
   0x4   :  { %s33_s25 = sshll.u32 %s1954_s24, 4  ;;  %p1861_p0 = scmp.ne.s32.totalorder %s2102_s1, %s1860_s28  ;;  %s34_s25 = int_to_ptr.vmem [resolvable:$true] %s33_s25 }
   0x5   :  { %p1864_p1 = scmp.lt.u32.totalorder %s1860_s28, %s2102_s1 }
   0x7   :  { %p1866_p2 = pnand %p1864_p1, %p1861_p0 }
   0x9   :  { %1869 = shalt.err (!%p1866_p2)
}
   0xa   :  { %s1870_s10 = scalar_lea.vmem %s34_s25, 12288  ;;  %p1875_p4 = scmp.lt.s32.totalorder %s34_s25, %s34_s25 }
   0xb   :  { %p1871_p3 = scmp.ne.s32.totalorder %s34_s25, %s1870_s10  ;;  %p1876_p5 = scmp.lt.s32.totalorder %s1870_s10, %s1870_s10 }
   0xd   :  { %p1877_p6 = por %p1876_p5, %p1875_p4 }
   0xf   :  { %p1878_p7 = pnand %p1877_p6, %p1871_p3 }
  0x11   :  { %1881 = shalt.err (!%p1878_p7)
}
  0x12   :  { %s1955_s11 = smov 256   ;;  %s1956_s12 = smov 16  }
  0x13   :  { %39 = dma.hbm_to_vmem [thread:$0]  %s2102_s1, 12288, %s34_s25, [#allocation7], %s1955_s11, %s1955_s11, %s1956_s12  }
  0x14   :  { %s1957_s15 = smov [#allocation3]   ;;  %s1882_s19 = scalar_lea.hbm %s2101_s0, 384 }
  0x15   :  { %s21_s16 = sshll.u32 %s1957_s15, 4  ;;  %p1883_p8 = scmp.ne.s32.totalorder %s2101_s0, %s1882_s19  ;;  %s22_s16 = int_to_ptr.vmem [resolvable:$true] %s21_s16 }
  0x16   :  { %p1886_p9 = scmp.lt.u32.totalorder %s1882_s19, %s2101_s0 }
  0x18   :  { %p1888_p10 = pnand %p1886_p9, %p1883_p8 }
  0x1a   :  { %1891 = shalt.err (!%p1888_p10)
}
  0x1b   :  { %s1892_s24 = scalar_lea.vmem %s22_s16, 384  ;;  %s1896_s1 = scalar_lea.vmem %s22_s16, 768 }
  0x1c   :  { %p1893_p11 = scmp.ne.s32.totalorder %s22_s16, %s1892_s24  ;;  %p1897_p12 = scmp.lt.s32.totalorder %s22_s16, %s22_s16 }
  0x1d   :  { %p1898_p13 = scmp.lt.s32.totalorder %s1896_s1, %s1892_s24 }
  0x1f   :  { %p1899_p0 = por %p1898_p13, %p1897_p12 }
  0x21   :  { %p1900_p1 = pnand %p1899_p0, %p1893_p11 }
  0x23   :  { %1903 = shalt.err (!%p1900_p1)
}
  0x24   :  { %s1958_s25 = smov 384   ;;  %s1959_s26 = smov 24  }
  0x25   :  { %27 = dma.hbm_to_vmem [thread:$0]  %s2101_s0, 384, %s22_s16, [#allocation4], %s1958_s25, %s1958_s25, %s1959_s26  }
  0x26   :  { %s1960_s29 = smov [#allocation8]   ;;  %s1904_s10 = scalar_lea.hbm %s2104_s3, 8192 }
  0x27   :  { %s47_s30 = sshll.u32 %s1960_s29, 4  ;;  %p1905_p2 = scmp.ne.s32.totalorder %s2104_s3, %s1904_s10  ;;  %s48_s30 = int_to_ptr.vmem [resolvable:$true] %s47_s30 }
  0x28   :  { %p1908_p3 = scmp.lt.u32.totalorder %s1904_s10, %s2104_s3 }
  0x2a   :  { %p1910_p4 = pnand %p1908_p3, %p1905_p2 }
  0x2c   :  { %1913 = shalt.err (!%p1910_p4)
}
  0x2d   :  { %s1914_s15 = scalar_lea.vmem %s48_s30, 8192  ;;  %p1919_p6 = scmp.lt.s32.totalorder %s48_s30, %s48_s30 }
  0x2e   :  { %p1915_p5 = scmp.ne.s32.totalorder %s48_s30, %s1914_s15  ;;  %p1920_p7 = scmp.lt.s32.totalorder %s1914_s15, %s1914_s15 }
  0x30   :  { %p1921_p8 = por %p1920_p7, %p1919_p6 }
  0x32   :  { %p1922_p9 = pnand %p1921_p8, %p1915_p5 }
  0x34   :  { %1925 = shalt.err (!%p1922_p9)
}
  0x35   :  { %s1961_s0 = smov 128   ;;  %s1962_s16 = smov 8  }
  0x36   :  { %53 = dma.hbm_to_vmem [thread:$0]  %s2104_s3, 8192, %s48_s30, [#allocation7], %s1961_s0, %s1961_s0, %s1962_s16  }
  0x37   :  { %1948 = dma.done.wait [#allocation4], 768  }
  0x38   :  { %1949 = vsyncadd [#allocation4], 4294966528 }
  0x39   :  { %1950 = dma.done.wait [#allocation7], 20480  }
  0x3a   :  { %1951 = vsyncadd [#allocation7], 4294946816  ;;  %v1963_v0 = vmov 0   ;;  %v1612_v1 = vld [vmem:[#allocation6 + $0x4] ss:$16 sps:$4 sm:$0xff]   ;;  %v71_v31 = vld [vmem:[#allocation3 + $0x8] sm:$0xff] }
  0x3b   :  { %752 = vmatprep.mubr.bf16.mxu0 %v1963_v0  ;;  %v1614_v2 = vld [vmem:[#allocation6] ss:$16 sps:$4 sm:$0xff]   ;;  %677 = vmatprep.subr.bf16.mxu1 %v1612_v1  ;;  %v1615_v3 = vld [vmem:[#allocation6 + $0x24] ss:$16 sps:$4 sm:$0xff]   ;;  %v75_v43 = vld [vmem:[#allocation3 + $0x28] sm:$0xff]  ;;  %vm1396_vm0 = vcmask 130112  }
  0x3c   :  { %678 = vmatpush1.bf16.msra.mxu1 %v1614_v2  ;;  %v1617_v4 = vld [vmem:[#allocation6 + $0x20] ss:$16 sps:$4 sm:$0xff]   ;;  %v1618_v5 = vld [vmem:[#allocation6 + $0x44] ss:$16 sps:$4 sm:$0xff]   ;;  %v73_v56 = vld [vmem:[#allocation3 + $0x18] sm:$0xff]  ;;  %vm1399_vm1 = vcmask 122880  }
  0x3d   :  { %679 = vmatprep.subr.bf16.mxu1 %v1615_v3  ;;  %v1620_v6 = vld [vmem:[#allocation6 + $0x40] ss:$16 sps:$4 sm:$0xff]   ;;  %v1621_v7 = vld [vmem:[#allocation6 + $0x64] ss:$16 sps:$4 sm:$0xff]   ;;  %v1686_v57 = vld [vmem:[#allocation6 + $0xc] ss:$16 sps:$4 sm:$0xff]  }
  0x3e   :  { %v1623_v8 = vld [vmem:[#allocation6 + $0x60] ss:$16 sps:$4 sm:$0xff]   ;;  %v1624_v9 = vld [vmem:[#allocation6 + $0x84] ss:$16 sps:$4 sm:$0xff]   ;;  %v1684_v59 = vld [vmem:[#allocation6 + $0x8] ss:$16 sps:$4 sm:$0xff]  }
  0x3f   :  { %v1639_v10 = vld [vmem:[#allocation6 + $0x204] ss:$16 sps:$4 sm:$0xff]   ;;  %v1641_v11 = vld [vmem:[#allocation6 + $0x200] ss:$16 sps:$4 sm:$0xff]   ;;  %v1689_v60 = vld [vmem:[#allocation6 + $0x2c] ss:$16 sps:$4 sm:$0xff]  }
  0x40   :  { %680 = vmatpush1.bf16.msra.mxu1 %v1617_v4  ;;  %v1626_v12 = vld [vmem:[#allocation6 + $0x80] ss:$16 sps:$4 sm:$0xff]   ;;  %720 = vmatprep.subr.bf16.mxu0 %v1639_v10  ;;  %v1645_v13 = vld [vmem:[#allocation6 + $0x224] ss:$16 sps:$4 sm:$0xff]   ;;  %v1687_v61 = vld [vmem:[#allocation6 + $0x28] ss:$16 sps:$4 sm:$0xff]  }
  0x41   :  { %681 = vmatprep.subr.bf16.mxu1 %v1618_v5  ;;  %721 = vmatpush1.bf16.msra.mxu0 %v1641_v11  ;;  %v1647_v14 = vld [vmem:[#allocation6 + $0x220] ss:$16 sps:$4 sm:$0xff]   ;;  %v1627_v15 = vld [vmem:[#allocation6 + $0xa4] ss:$16 sps:$4 sm:$0xff]   ;;  %v1692_v1 = vld [vmem:[#allocation6 + $0x4c] ss:$16 sps:$4 sm:$0xff]  }
  0x42   :  { %722 = vmatprep.subr.bf16.mxu0 %v1645_v13  ;;  %v1629_v16 = vld [vmem:[#allocation6 + $0xa0] ss:$16 sps:$4 sm:$0xff]   ;;  %v1651_v17 = vld [vmem:[#allocation6 + $0x244] ss:$16 sps:$4 sm:$0xff]   ;;  %v1690_v3 = vld [vmem:[#allocation6 + $0x48] ss:$16 sps:$4 sm:$0xff]  }
  0x43   :  { %v1630_v18 = vld [vmem:[#allocation6 + $0xc4] ss:$16 sps:$4 sm:$0xff]   ;;  %v1653_v19 = vld [vmem:[#allocation6 + $0x240] ss:$16 sps:$4 sm:$0xff]   ;;  %v1698_v10 = vld [vmem:[#allocation6 + $0x8c] ss:$16 sps:$4 sm:$0xff]  }
  0x44   :  { %682 = vmatpush1.bf16.msra.mxu1 %v1620_v6  ;;  %v1657_v20 = vld [vmem:[#allocation6 + $0x264] ss:$16 sps:$4 sm:$0xff]   ;;  %v1632_v21 = vld [vmem:[#allocation6 + $0xc0] ss:$16 sps:$4 sm:$0xff]   ;;  %v1695_v6 = vld [vmem:[#allocation6 + $0x6c] ss:$16 sps:$4 sm:$0xff]  }
  0x45   :  { %683 = vmatprep.subr.bf16.mxu1 %v1621_v7  ;;  %723 = vmatpush1.bf16.msra.mxu0 %v1647_v14  ;;  %v1633_v22 = vld [vmem:[#allocation6 + $0xe4] ss:$16 sps:$4 sm:$0xff]   ;;  %v1659_v23 = vld [vmem:[#allocation6 + $0x260] ss:$16 sps:$4 sm:$0xff]   ;;  %v1693_v7 = vld [vmem:[#allocation6 + $0x68] ss:$16 sps:$4 sm:$0xff]  }
  0x46   :  { %724 = vmatprep.subr.bf16.mxu0 %v1651_v17  ;;  %v1663_v24 = vld [vmem:[#allocation6 + $0x284] ss:$16 sps:$4 sm:$0xff]   ;;  %v1635_v25 = vld [vmem:[#allocation6 + $0xe0] ss:$16 sps:$4 sm:$0xff]   ;;  %v1696_v11 = vld [vmem:[#allocation6 + $0x88] ss:$16 sps:$4 sm:$0xff]  }
  0x47   :  { %v1636_v26 = vld [vmem:[#allocation6 + $0x104] ss:$16 sps:$4 sm:$0xff]   ;;  %v1665_v27 = vld [vmem:[#allocation6 + $0x280] ss:$16 sps:$4 sm:$0xff]   ;;  %v1701_v14 = vld [vmem:[#allocation6 + $0xac] ss:$16 sps:$4 sm:$0xff]  }
  0x48   :  { %684 = vmatpush1.bf16.msra.mxu1 %v1623_v8  ;;  %v1669_v28 = vld [vmem:[#allocation6 + $0x2a4] ss:$16 sps:$4 sm:$0xff]   ;;  %v1638_v29 = vld [vmem:[#allocation6 + $0x100] ss:$16 sps:$4 sm:$0xff]   ;;  %v1704_v17 = vld [vmem:[#allocation6 + $0xcc] ss:$16 sps:$4 sm:$0xff]  }
  0x49   :  { %685 = vmatprep.subr.bf16.mxu1 %v1624_v9  ;;  %725 = vmatpush1.bf16.msra.mxu0 %v1653_v19  ;;  %v1671_v30 = vld [vmem:[#allocation6 + $0x2a0] ss:$16 sps:$4 sm:$0xff]   ;;  %v1642_v32 = vld [vmem:[#allocation6 + $0x124] ss:$16 sps:$4 sm:$0xff]  }
  0x4a   :  { %726 = vmatprep.subr.bf16.mxu0 %v1657_v20  ;;  %v1675_v33 = vld [vmem:[#allocation6 + $0x2c4] ss:$16 sps:$4 sm:$0xff]   ;;  %v1644_v36 = vld [vmem:[#allocation6 + $0x120] ss:$16 sps:$4 sm:$0xff]   ;;  %v1702_v20 = vld [vmem:[#allocation6 + $0xc8] ss:$16 sps:$4 sm:$0xff]  }
  0x4b   :  { %v74_v34 = vld [vmem:[#allocation3 + $0x20] sm:$0xff]  ;;  %v72_v42 = vld [vmem:[#allocation3 + $0x10] sm:$0xff] }
  0x4c   :  { %686 = vmatpush1.bf16.msra.mxu1 %v1626_v12  ;;  %v77_v35 = vpack.c.bf16 %v74_v34, %v71_v31  ;;  %v1677_v37 = vld [vmem:[#allocation6 + $0x2c0] ss:$16 sps:$4 sm:$0xff]   ;;  %v1648_v38 = vld [vmem:[#allocation6 + $0x144] ss:$16 sps:$4 sm:$0xff]   ;;  %v2042_v45 = vpack.c.bf16 %v75_v43, %v72_v42  ;;  %v1716_v34 = vld [vmem:[#allocation6 + $0x14c] ss:$16 sps:$4 sm:$0xff]  }
  0x4d   :  { %687 = vmatprep.subr.bf16.mxu1 %v1627_v15  ;;  %727 = vmatpush1.bf16.msra.mxu0 %v1659_v23  ;;  %v1681_v39 = vld [vmem:[#allocation6 + $0x2e4] ss:$16 sps:$4 sm:$0xff]   ;;  %v1650_v40 = vld [vmem:[#allocation6 + $0x140] ss:$16 sps:$4 sm:$0xff]   ;;  %v1699_v15 = vld [vmem:[#allocation6 + $0xa8] ss:$16 sps:$4 sm:$0xff]  }
  0x4e   :  { %728 = vmatprep.subr.bf16.mxu0 %v1663_v24  ;;  %709 = vmatprep.mubr.bf16.mxu1 %v77_v35  ;;  %v1683_v41 = vld [vmem:[#allocation6 + $0x2e0] ss:$16 sps:$4 sm:$0xff]   ;;  %v1654_v44 = vld [vmem:[#allocation6 + $0x164] ss:$16 sps:$4 sm:$0xff]   ;;  %v1705_v24 = vld [vmem:[#allocation6 + $0xe8] ss:$16 sps:$4 sm:$0xff]  }
  0x4f   :  { %v1656_v46 = vld [vmem:[#allocation6 + $0x160] ss:$16 sps:$4 sm:$0xff]   ;;  %v1660_v47 = vld [vmem:[#allocation6 + $0x184] ss:$16 sps:$4 sm:$0xff]   ;;  %v1722_v42 = vld [vmem:[#allocation6 + $0x18c] ss:$16 sps:$4 sm:$0xff]  }
  0x50   :  { %688 = vmatpush1.bf16.msra.mxu1 %v1629_v16  ;;  %v1662_v48 = vld [vmem:[#allocation6 + $0x180] ss:$16 sps:$4 sm:$0xff]   ;;  %v1666_v49 = vld [vmem:[#allocation6 + $0x1a4] ss:$16 sps:$4 sm:$0xff]  }
  0x51   :  { %689 = vmatprep.subr.bf16.mxu1 %v1630_v18  ;;  %729 = vmatpush1.bf16.msra.mxu0 %v1665_v27  ;;  %v1668_v50 = vld [vmem:[#allocation6 + $0x1a0] ss:$16 sps:$4 sm:$0xff]   ;;  %v1672_v51 = vld [vmem:[#allocation6 + $0x1c4] ss:$16 sps:$4 sm:$0xff]  }
  0x52   :  { %730 = vmatprep.subr.bf16.mxu0 %v1669_v28  ;;  %v1674_v52 = vld [vmem:[#allocation6 + $0x1c0] ss:$16 sps:$4 sm:$0xff]   ;;  %v1678_v53 = vld [vmem:[#allocation6 + $0x1e4] ss:$16 sps:$4 sm:$0xff]   ;;  %v1708_v28 = vld [vmem:[#allocation6 + $0x108] ss:$16 sps:$4 sm:$0xff]  }
  0x53   :  { %v1680_v54 = vld [vmem:[#allocation6 + $0x1e0] ss:$16 sps:$4 sm:$0xff]   ;;  %v1758_v63 = vld [vmem:[#allocation8 + $0x4] ss:$8 sps:$4 sm:$0xff]   ;;  %v1761_v2 = vld [vmem:[#allocation8 + $0x14] ss:$8 sps:$4 sm:$0xff]  }
  0x54   :  { %690 = vmatpush1.bf16.msra.mxu1 %v1632_v21  ;;  %v70_v55 = vld [vmem:[#allocation3] sm:$0xff]  ;;  %v1756_v62 = vld [vmem:[#allocation8] ss:$8 sps:$4 sm:$0xff]   ;;  %v1764_v5 = vld [vmem:[#allocation8 + $0x24] ss:$8 sps:$4 sm:$0xff]  }
  0x55   :  { %691 = vmatprep.subr.bf16.mxu1 %v1633_v22  ;;  %731 = vmatpush1.bf16.msra.mxu0 %v1671_v30  ;;  %v2045_v58 = vpack.c.bf16 %v73_v56, %v70_v55  ;;  %v1759_v4 = vld [vmem:[#allocation8 + $0x10] ss:$8 sps:$4 sm:$0xff]   ;;  %v1762_v8 = vld [vmem:[#allocation8 + $0x20] ss:$8 sps:$4 sm:$0xff]   ;;  %v1767_v9 = vld [vmem:[#allocation8 + $0x34] ss:$8 sps:$4 sm:$0xff]  }
  0x56   :  { %732 = vmatprep.subr.bf16.mxu0 %v1675_v33  ;;  %v1765_v12 = vld [vmem:[#allocation8 + $0x30] ss:$8 sps:$4 sm:$0xff]   ;;  %v1770_v13 = vld [vmem:[#allocation8 + $0x44] ss:$8 sps:$4 sm:$0xff]   ;;  %v1768_v16 = vld [vmem:[#allocation8 + $0x40] ss:$8 sps:$4 sm:$0xff]  }
  0x57   :  { %v1773_v18 = vld [vmem:[#allocation8 + $0x54] ss:$8 sps:$4 sm:$0xff]   ;;  %v1771_v19 = vld [vmem:[#allocation8 + $0x50] ss:$8 sps:$4 sm:$0xff]   ;;  %v1776_v21 = vld [vmem:[#allocation8 + $0x64] ss:$8 sps:$4 sm:$0xff]  }
  0x58   :  { %692 = vmatpush1.bf16.msra.mxu1 %v1635_v25  ;;  %v1707_v22 = vld [vmem:[#allocation6 + $0xec] ss:$16 sps:$4 sm:$0xff]   ;;  %v1774_v23 = vld [vmem:[#allocation8 + $0x60] ss:$8 sps:$4 sm:$0xff]   ;;  %v1777_v27 = vld [vmem:[#allocation8 + $0x70] ss:$8 sps:$4 sm:$0xff]  }
  0x59   :  { %693 = vmatprep.subr.bf16.mxu1 %v1636_v26  ;;  %733 = vmatpush1.bf16.msra.mxu0 %v1677_v37  ;;  %v1779_v25 = vld [vmem:[#allocation8 + $0x74] ss:$8 sps:$4 sm:$0xff]   ;;  %v1780_v31 = vld [vmem:[#allocation8 + $0x80] ss:$8 sps:$4 sm:$0xff]   ;;  %v1788_v37 = vld [vmem:[#allocation8 + $0xa4] ss:$8 sps:$4 sm:$0xff]  }
  0x5a   :  { %734 = vmatprep.subr.bf16.mxu0 %v1681_v39  ;;  %v1710_v26 = vld [vmem:[#allocation6 + $0x10c] ss:$16 sps:$4 sm:$0xff]   ;;  %v1786_v39 = vld [vmem:[#allocation8 + $0xa0] ss:$8 sps:$4 sm:$0xff]   ;;  %v1789_v43 = vld [vmem:[#allocation8 + $0xb0] ss:$8 sps:$4 sm:$0xff]  }
  0x5b   :  { %v1713_v30 = vld [vmem:[#allocation6 + $0x12c] ss:$16 sps:$4 sm:$0xff]   ;;  %v1732_v55 = vld [vmem:[#allocation6 + $0x208] ss:$16 sps:$4 sm:$0xff]  }
  0x5c   :  { %694 = vmatpush1.bf16.msra.mxu1 %v1638_v29  ;;  %v1782_v29 = vld [vmem:[#allocation8 + $0x84] ss:$8 sps:$4 sm:$0xff]   ;;  %v1785_v33 = vld [vmem:[#allocation8 + $0x94] ss:$8 sps:$4 sm:$0xff]  }
  0x5d   :  { %695 = vmatprep.subr.bf16.mxu1 %v1642_v32  ;;  %735 = vmatpush1.bf16.msra.mxu0 %v1683_v41  ;;  %v1711_v32 = vld [vmem:[#allocation6 + $0x128] ss:$16 sps:$4 sm:$0xff]   ;;  %v1791_v41 = vld [vmem:[#allocation8 + $0xb4] ss:$8 sps:$4 sm:$0xff]  }
  0x5e   :  { %1257 = vmatprep.subr.bf16.mxu0 %v1758_v63  ;;  %v1737_v56 = vld [vmem:[#allocation6 + $0x22c] ss:$16 sps:$4 sm:$0xff]  }
  0x5f   :  { %v1746_v63 = vld [vmem:[#allocation6 + $0x28c] ss:$16 sps:$4 sm:$0xff]  }
  0x60   :  { %696 = vmatpush1.bf16.msra.mxu1 %v1644_v36  ;;  %753 = vmatmul.mubr.bf16.vlgmr.msra.gmra.mrb[0].mxu0 %v2042_v45  ;;  %v1714_v36 = vld [vmem:[#allocation6 + $0x148] ss:$16 sps:$4 sm:$0xff]  }
  0x61   :  { %697 = vmatprep.subr.bf16.mxu1 %v1648_v38  ;;  %1258 = vmatpush1.bf16.msra.mxu0 %v1756_v62  ;;  %v1719_v38 = vld [vmem:[#allocation6 + $0x16c] ss:$16 sps:$4 sm:$0xff]   ;;  %v1741_v62 = vld [vmem:[#allocation6 + $0x268] ss:$16 sps:$4 sm:$0xff]  }
  0x62   :  { %1259 = vmatprep.subr.bf16.mxu0 %v1761_v2  ;;  %v1749_v2 = vld [vmem:[#allocation6 + $0x2ac] ss:$16 sps:$4 sm:$0xff]  }
  0x64   :  { %698 = vmatpush1.bf16.msra.mxu1 %v1650_v40  ;;  %v1717_v40 = vld [vmem:[#allocation6 + $0x168] ss:$16 sps:$4 sm:$0xff]  }
  0x65   :  { %699 = vmatprep.subr.bf16.mxu1 %v1654_v44  ;;  %1260 = vmatpush1.bf16.msra.mxu0 %v1759_v4  ;;  %v1720_v44 = vld [vmem:[#allocation6 + $0x188] ss:$16 sps:$4 sm:$0xff]   ;;  %v1797_v4 = vld [vmem:[#allocation8 + $0xd4] ss:$8 sps:$4 sm:$0xff]  }
  0x66   :  { %1261 = vmatprep.subr.bf16.mxu0 %v1764_v5  ;;  %v1750_v5 = vld [vmem:[#allocation6 + $0x2c8] ss:$16 sps:$4 sm:$0xff]  }
  0x68   :  { %700 = vmatpush1.bf16.msra.mxu1 %v1656_v46  ;;  %v1794_v46 = vld [vmem:[#allocation8 + $0xc4] ss:$8 sps:$4 sm:$0xff]  }
  0x69   :  { %701 = vmatprep.subr.bf16.mxu1 %v1660_v47  ;;  %1262 = vmatpush1.bf16.msra.mxu0 %v1762_v8  ;;  %v1725_v47 = vld [vmem:[#allocation6 + $0x1ac] ss:$16 sps:$4 sm:$0xff]   ;;  %v1798_v8 = vld [vmem:[#allocation8 + $0xe0] ss:$8 sps:$4 sm:$0xff]  }
  0x6a   :  { %1263 = vmatprep.subr.bf16.mxu0 %v1767_v9  ;;  %v1753_v9 = vld [vmem:[#allocation6 + $0x2e8] ss:$16 sps:$4 sm:$0xff]  }
  0x6c   :  { %702 = vmatpush1.bf16.msra.mxu1 %v1662_v48  ;;  %v1792_v48 = vld [vmem:[#allocation8 + $0xc0] ss:$8 sps:$4 sm:$0xff]  }
  0x6d   :  { %703 = vmatprep.subr.bf16.mxu1 %v1666_v49  ;;  %1264 = vmatpush1.bf16.msra.mxu0 %v1765_v12  ;;  %v1723_v49 = vld [vmem:[#allocation6 + $0x1a8] ss:$16 sps:$4 sm:$0xff]   ;;  %v1806_v12 = vld [vmem:[#allocation8 + $0x104] ss:$8 sps:$4 sm:$0xff]  }
  0x6e   :  { %1265 = vmatprep.subr.bf16.mxu0 %v1770_v13 }
  0x70   :  { %704 = vmatpush1.bf16.msra.mxu1 %v1668_v50  ;;  %v1728_v50 = vld [vmem:[#allocation6 + $0x1cc] ss:$16 sps:$4 sm:$0xff]  }
  0x71   :  { %705 = vmatprep.subr.bf16.mxu1 %v1672_v51  ;;  %1266 = vmatpush1.bf16.msra.mxu0 %v1768_v16  ;;  %v1726_v51 = vld [vmem:[#allocation6 + $0x1c8] ss:$16 sps:$4 sm:$0xff]  }
  0x72   :  { %1267 = vmatprep.subr.bf16.mxu0 %v1773_v18 }
  0x74   :  { %706 = vmatpush1.bf16.msra.mxu1 %v1674_v52  ;;  %v1731_v52 = vld [vmem:[#allocation6 + $0x1ec] ss:$16 sps:$4 sm:$0xff]  }
  0x75   :  { %707 = vmatprep.subr.bf16.mxu1 %v1678_v53  ;;  %1268 = vmatpush1.bf16.msra.mxu0 %v1771_v19  ;;  %v1729_v53 = vld [vmem:[#allocation6 + $0x1e8] ss:$16 sps:$4 sm:$0xff]  }
  0x76   :  { %1269 = vmatprep.subr.bf16.mxu0 %v1776_v21 }
  0x78   :  { %708 = vmatpush1.bf16.msra.mxu1 %v1680_v54  ;;  %v1734_v54 = vld [vmem:[#allocation6 + $0x20c] ss:$16 sps:$4 sm:$0xff]  }
  0x79   :  { %763 = vmatprep.subr.bf16.mxu1 %v1686_v57  ;;  %1270 = vmatpush1.bf16.msra.mxu0 %v1774_v23  ;;  %v1735_v57 = vld [vmem:[#allocation6 + $0x228] ss:$16 sps:$4 sm:$0xff]  }
  0x7a   :  { %1271 = vmatprep.subr.bf16.mxu0 %v1779_v25 }
  0x7b   :  { %710 = vmatmul.mubr.bf16.vlgmr.msra.gmra.mrb[0].mxu1 %v2045_v58 }
  0x7c   :  { %764 = vmatpush1.bf16.msra.mxu1 %v1684_v59  ;;  %795 = vmatprep.mubr.bf16.mxu1 %v77_v35  ;;  %v1783_v35 = vld [vmem:[#allocation8 + $0x90] ss:$8 sps:$4 sm:$0xff]   ;;  %v1740_v59 = vld [vmem:[#allocation6 + $0x24c] ss:$16 sps:$4 sm:$0xff]  }
  0x7d   :  { %765 = vmatprep.subr.bf16.mxu1 %v1689_v60  ;;  %1272 = vmatpush1.bf16.msra.mxu0 %v1777_v27  ;;  %v1738_v60 = vld [vmem:[#allocation6 + $0x248] ss:$16 sps:$4 sm:$0xff]  }
  0x7e   :  { %1273 = vmatprep.subr.bf16.mxu0 %v1782_v29 }
  0x80   :  { %766 = vmatpush1.bf16.msra.mxu1 %v1687_v61  ;;  %v1743_v61 = vld [vmem:[#allocation6 + $0x26c] ss:$16 sps:$4 sm:$0xff]  }
  0x81   :  { %767 = vmatprep.subr.bf16.mxu1 %v1692_v1  ;;  %1274 = vmatpush1.bf16.msra.mxu0 %v1780_v31  ;;  %v1744_v1 = vld [vmem:[#allocation6 + $0x288] ss:$16 sps:$4 sm:$0xff]  }
  0x82   :  { %1275 = vmatprep.subr.bf16.mxu0 %v1785_v33 }
  0x84   :  { %768 = vmatpush1.bf16.msra.mxu1 %v1690_v3  ;;  %v1752_v3 = vld [vmem:[#allocation6 + $0x2cc] ss:$16 sps:$4 sm:$0xff]  }
  0x85   :  { %769 = vmatprep.subr.bf16.mxu1 %v1695_v6  ;;  %1276 = vmatpush1.bf16.msra.mxu0 %v1783_v35  ;;  %v1755_v6 = vld [vmem:[#allocation6 + $0x2ec] ss:$16 sps:$4 sm:$0xff]  }
  0x86   :  { %1277 = vmatprep.subr.bf16.mxu0 %v1788_v37 }
  0x88   :  { %770 = vmatpush1.bf16.msra.mxu1 %v1693_v7  ;;  %v1800_v7 = vld [vmem:[#allocation8 + $0xe4] ss:$8 sps:$4 sm:$0xff]  }
  0x89   :  { %771 = vmatprep.subr.bf16.mxu1 %v1698_v10  ;;  %1278 = vmatpush1.bf16.msra.mxu0 %v1786_v39  ;;  %v1803_v10 = vld [vmem:[#allocation8 + $0xf4] ss:$8 sps:$4 sm:$0xff]  }
  0x8a   :  { %1279 = vmatprep.subr.bf16.mxu0 %v1791_v41  ;;  %v1804_v41 = vld [vmem:[#allocation8 + $0x100] ss:$8 sps:$4 sm:$0xff]  }
  0x8c   :  { %772 = vmatpush1.bf16.msra.mxu1 %v1696_v11  ;;  %v1801_v11 = vld [vmem:[#allocation8 + $0xf0] ss:$8 sps:$4 sm:$0xff]  }
  0x8d   :  { %773 = vmatprep.subr.bf16.mxu1 %v1701_v14  ;;  %1280 = vmatpush1.bf16.msra.mxu0 %v1789_v43  ;;  %v1807_v43 = vld [vmem:[#allocation8 + $0x110] ss:$8 sps:$4 sm:$0xff]  }
  0x8e   :  { %1281 = vmatprep.subr.bf16.mxu0 %v1794_v46  ;;  %v1810_v46 = vld [vmem:[#allocation8 + $0x120] ss:$8 sps:$4 sm:$0xff]  }
  0x90   :  { %774 = vmatpush1.bf16.msra.mxu1 %v1699_v15 }
  0x91   :  { %775 = vmatprep.subr.bf16.mxu1 %v1704_v17  ;;  %1282 = vmatpush1.bf16.msra.mxu0 %v1792_v48  ;;  %v177_v17 = vlaneseq  ;;  %v1813_v48 = vld [vmem:[#allocation8 + $0x130] ss:$8 sps:$4 sm:$0xff]  }
  0x92   :  { %1283 = vmatprep.subr.bf16.mxu0 %v1797_v4  ;;  %v1845_v4 = vld [vmem:[#allocation8 + $0x1d4] ss:$8 sps:$4 sm:$0xff]  }
  0x93   :  { %v2052_v18 = vshrl.u32 %v177_v17, 7 }
  0x94   :  { %776 = vmatpush1.bf16.msra.mxu1 %v1702_v20  ;;  %v2060_v20 = vld [vmem:[%s2103_s2] sm:$0xf] }
  0x95   :  { %777 = vmatprep.subr.bf16.mxu1 %v1707_v22  ;;  %v2055_v19 = vsub.s32 0, %v2052_v18 }
  0x97   :  { %v180_v21 = vrot.slane %v2060_v20, %v2055_v19 }
  0x98   :  { %778 = vmatpush1.bf16.msra.mxu1 %v1705_v24 }
  0x99   :  { %779 = vmatprep.subr.bf16.mxu1 %v1710_v26 }
  0x9c   :  { %780 = vmatpush1.bf16.msra.mxu1 %v1708_v28 }
  0x9d   :  { %781 = vmatprep.subr.bf16.mxu1 %v1713_v30 }
  0xa0   :  { %782 = vmatpush1.bf16.msra.mxu1 %v1711_v32 }
  0xa1   :  { %783 = vmatprep.subr.bf16.mxu1 %v1716_v34 }
  0xa4   :  { %784 = vmatpush1.bf16.msra.mxu1 %v1714_v36 }
  0xa5   :  { %785 = vmatprep.subr.bf16.mxu1 %v1719_v38 }
  0xa8   :  { %786 = vmatpush1.bf16.msra.mxu1 %v1717_v40 }
  0xa9   :  { %787 = vmatprep.subr.bf16.mxu1 %v1722_v42  ;;  %v1809_v42 = vld [vmem:[#allocation8 + $0x114] ss:$8 sps:$4 sm:$0xff]  }
  0xac   :  { %788 = vmatpush1.bf16.msra.mxu1 %v1720_v44  ;;  %v1812_v44 = vld [vmem:[#allocation8 + $0x124] ss:$8 sps:$4 sm:$0xff]  }
  0xad   :  { %789 = vmatprep.subr.bf16.mxu1 %v1725_v47  ;;  %v1815_v47 = vld [vmem:[#allocation8 + $0x134] ss:$8 sps:$4 sm:$0xff]  }
  0xb0   :  { %790 = vmatpush1.bf16.msra.mxu1 %v1723_v49  ;;  %v1818_v49 = vld [vmem:[#allocation8 + $0x144] ss:$8 sps:$4 sm:$0xff]  }
  0xb1   :  { %791 = vmatprep.subr.bf16.mxu1 %v1728_v50  ;;  %v1816_v50 = vld [vmem:[#allocation8 + $0x140] ss:$8 sps:$4 sm:$0xff]  }
  0xb4   :  { %792 = vmatpush1.bf16.msra.mxu1 %v1726_v51  ;;  %v1821_v51 = vld [vmem:[#allocation8 + $0x154] ss:$8 sps:$4 sm:$0xff]  }
  0xb5   :  { %793 = vmatprep.subr.bf16.mxu1 %v1731_v52  ;;  %v1819_v52 = vld [vmem:[#allocation8 + $0x150] ss:$8 sps:$4 sm:$0xff]  }
  0xb8   :  { %794 = vmatpush1.bf16.msra.mxu1 %v1729_v53  ;;  %v1824_v53 = vld [vmem:[#allocation8 + $0x164] ss:$8 sps:$4 sm:$0xff]  }
  0xb9   :  { %806 = vmatprep.subr.bf16.mxu1 %v1734_v54  ;;  %v1822_v54 = vld [vmem:[#allocation8 + $0x160] ss:$8 sps:$4 sm:$0xff]  }
  0xbb   :  { %796 = vmatmul.mubr.bf16.vlgmr.msra.gmra.mrb[4].mxu1 %v2045_v58  ;;  %v1747_v58 = vld [vmem:[#allocation6 + $0x2a8] ss:$16 sps:$4 sm:$0xff]  }
  0xbc   :  { %807 = vmatpush1.bf16.msra.mxu1 %v1732_v55  ;;  %838 = vmatprep.mubr.bf16.mxu1 %v1963_v0  ;;  %v1795_v0 = vld [vmem:[#allocation8 + $0xd0] ss:$8 sps:$4 sm:$0xff]   ;;  %v1827_v55 = vld [vmem:[#allocation8 + $0x174] ss:$8 sps:$4 sm:$0xff]  }
  0xbd   :  { %808 = vmatprep.subr.bf16.mxu1 %v1737_v56  ;;  %1284 = vmatpush1.bf16.msra.mxu0 %v1795_v0  ;;  %v1825_v56 = vld [vmem:[#allocation8 + $0x170] ss:$8 sps:$4 sm:$0xff]  }
  0xbe   :  { %1285 = vmatprep.subr.bf16.mxu0 %v1800_v7  ;;  %v1843_v0 = vld [vmem:[#allocation8 + $0x1d0] ss:$8 sps:$4 sm:$0xff]   ;;  %v1851_v7 = vld [vmem:[#allocation8 + $0x1f4] ss:$8 sps:$4 sm:$0xff]  }
  0xc0   :  { %809 = vmatpush1.bf16.msra.mxu1 %v1735_v57  ;;  %v1830_v57 = vld [vmem:[#allocation8 + $0x184] ss:$8 sps:$4 sm:$0xff]  }
  0xc1   :  { %810 = vmatprep.subr.bf16.mxu1 %v1740_v59  ;;  %1286 = vmatpush1.bf16.msra.mxu0 %v1798_v8  ;;  %v1828_v59 = vld [vmem:[#allocation8 + $0x180] ss:$8 sps:$4 sm:$0xff]   ;;  %v1849_v8 = vld [vmem:[#allocation8 + $0x1f0] ss:$8 sps:$4 sm:$0xff]  }
  0xc2   :  { %1287 = vmatprep.subr.bf16.mxu0 %v1803_v10  ;;  %v191_v10 = vsub.s32 3, %v2052_v18 }
  0xc4   :  { %811 = vmatpush1.bf16.msra.mxu1 %v1738_v60  ;;  %v1833_v60 = vld [vmem:[#allocation8 + $0x194] ss:$8 sps:$4 sm:$0xff]  }
  0xc5   :  { %812 = vmatprep.subr.bf16.mxu1 %v1743_v61  ;;  %1288 = vmatpush1.bf16.msra.mxu0 %v1801_v11  ;;  %v1831_v61 = vld [vmem:[#allocation8 + $0x190] ss:$8 sps:$4 sm:$0xff]  }
  0xc6   :  { %1300 = vmatprep.subr.bf16.mxu0 %v1806_v12  ;;  %v192_v12 = vrot.slane %v2060_v20, %v191_v10 }
  0xc8   :  { %813 = vmatpush1.bf16.msra.mxu1 %v1741_v62  ;;  %v1836_v62 = vld [vmem:[#allocation8 + $0x1a4] ss:$8 sps:$4 sm:$0xff]  }
  0xc9   :  { %814 = vmatprep.subr.bf16.mxu1 %v1746_v63  ;;  %v1834_v63 = vld [vmem:[#allocation8 + $0x1a0] ss:$8 sps:$4 sm:$0xff]  }
  0xcc   :  { %815 = vmatpush1.bf16.msra.mxu1 %v1744_v1  ;;  %v1839_v1 = vld [vmem:[#allocation8 + $0x1b4] ss:$8 sps:$4 sm:$0xff]  }
  0xcd   :  { %816 = vmatprep.subr.bf16.mxu1 %v1749_v2  ;;  %v1837_v2 = vld [vmem:[#allocation8 + $0x1b0] ss:$8 sps:$4 sm:$0xff]  }
  0xd0   :  { %817 = vmatpush1.bf16.msra.mxu1 %v1747_v58  ;;  %v1842_v58 = vld [vmem:[#allocation8 + $0x1c4] ss:$8 sps:$4 sm:$0xff]  }
  0xd1   :  { %818 = vmatprep.subr.bf16.mxu1 %v1752_v3  ;;  %v1840_v3 = vld [vmem:[#allocation8 + $0x1c0] ss:$8 sps:$4 sm:$0xff]  }
  0xd4   :  { %819 = vmatpush1.bf16.msra.mxu1 %v1750_v5  ;;  %v1848_v5 = vld [vmem:[#allocation8 + $0x1e4] ss:$8 sps:$4 sm:$0xff]  }
  0xd5   :  { %820 = vmatprep.subr.bf16.mxu1 %v1755_v6  ;;  %v1846_v6 = vld [vmem:[#allocation8 + $0x1e0] ss:$8 sps:$4 sm:$0xff]  }
  0xd8   :  { %821 = vmatpush1.bf16.msra.mxu1 %v1753_v9  ;;  %v187_v9 = vsub.s32 2, %v2052_v18 }
  0xda   :  { %v188_v11 = vrot.slane %v2060_v20, %v187_v9 }
  0xdb   :  { %839 = vmatmul.mubr.bf16.vlgmr.msra.gmra.mrb[4].mxu1 %v2042_v45  ;;  %v2063_v45 = vsub.s32 1, %v2052_v18 }
  0xdd   :  { %v184_v22 = vrot.slane %v2060_v20, %v2063_v45  ;;  %v925_v20 = vld [vmem:[%s2105_s4] sm:$0x3] }
 0x133   :  { %v754_v13 = vpop.f32.mrb[0].mxu0 }
 0x134   :  { %v756_v14 = vpop.f32.mrb[1].mxu0 }
 0x135   :  { %v758_v15 = vpop.f32.mrb[2].mxu0 }
 0x136   :  { %v760_v16 = vpop.f32.mrb[3].mxu0 }
 0x14e   :  { %v711_v23 = vpop.f32.mrb[0].mxu1 }
 0x14f   :  { %v712_v24 = vadd.f32 %v711_v23, %v180_v21  ;;  %v713_v25 = vpop.f32.mrb[1].mxu1 }
 0x150   :  { %v714_v26 = vadd.f32 %v713_v25, %v184_v22  ;;  %v715_v27 = vpop.f32.mrb[2].mxu1 }
 0x151   :  { %v716_v28 = vadd.f32 %v715_v27, %v180_v21  ;;  %v755_v29 = vadd.f32 %v754_v13, %v712_v24  ;;  %v717_v30 = vpop.f32.mrb[3].mxu1 }
 0x152   :  { %v718_v31 = vadd.f32 %v717_v30, %v184_v22  ;;  %v757_v32 = vadd.f32 %v756_v14, %v714_v26 }
 0x153   :  { %v849_v33 = vmax.f32 %v755_v29, 0.0  ;;  %v759_v34 = vadd.f32 %v758_v15, %v716_v28 }
 0x154   :  { %v761_v35 = vadd.f32 %v760_v16, %v718_v31  ;;  %v850_v37 = vmax.f32 %v757_v32, 0.0  ;;  %v930_v31 = vrot.slane %v925_v20, %v2055_v19  ;;  %v934_v32 = vrot.slane %v925_v20, %v2063_v45 }
 0x155   :  { %v853_v36 = vmax.f32 %v759_v34, 0.0 }
 0x156   :  { %v854_v38 = vmax.f32 %v761_v35, 0.0 }
 0x157   :  { %v857_v39 = vpack.c.bf16 %v853_v36, %v849_v33  ;;  %v1347_v33 = vld [vmem:[%s2106_s5] sm:$0x3] }
 0x158   :  { %v858_v40 = vpack.c.bf16 %v854_v38, %v850_v37  ;;  %v1352_v37 = vrot.slane %v1347_v33, %v2055_v19  ;;  %v1370_v19 = vstv %s2107_s6  ;;  %s1964_s6 = smov [#allocation9]  }
 0x159   :  { %s1407_s23 = sshll.u32 %s1964_s6, 4  ;;  %s1408_s23 = int_to_ptr.vmem [resolvable:$true] %s1407_s23 }
 0x15a   :  { %1289 = vmatprep.mubr.bf16.mxu0 %v858_v40  ;;  %v1356_v40 = vrot.slane %v1347_v33, %v2063_v45  ;;  %s1926_s24 = scalar_lea.vmem %s1408_s23, 16  ;;  %s1930_s1 = scalar_lea.vmem %s1408_s23, 32 }
 0x15b   :  { %1290 = vmatmul.mubr.bf16.vlgmr.msra.gmra.mrb[4].mxu0 %v857_v39  ;;  %p1927_p10 = scmp.ne.s32.totalorder %s1408_s23, %s1926_s24  ;;  %p1931_p11 = scmp.lt.s32.totalorder %s1408_s23, %s1408_s23 }
 0x15c   :  { %1301 = vmatpush1.bf16.msra.mxu0 %v1804_v41  ;;  %p1932_p12 = scmp.lt.s32.totalorder %s1930_s1, %s1926_s24 }
 0x15d   :  { %1302 = vmatprep.subr.bf16.mxu0 %v1809_v42 }
 0x15e   :  { %p1933_p13 = por %p1932_p12, %p1931_p11 }
 0x160   :  { %1303 = vmatpush1.bf16.msra.mxu0 %v1807_v43  ;;  %p1934_p0 = pnand %p1933_p13, %p1927_p10 }
 0x161   :  { %1304 = vmatprep.subr.bf16.mxu0 %v1812_v44 }
 0x164   :  { %1305 = vmatpush1.bf16.msra.mxu0 %v1810_v46 }
 0x165   :  { %1306 = vmatprep.subr.bf16.mxu0 %v1815_v47 }
 0x168   :  { %1307 = vmatpush1.bf16.msra.mxu0 %v1813_v48 }
 0x169   :  { %1308 = vmatprep.subr.bf16.mxu0 %v1818_v49 }
 0x16c   :  { %1309 = vmatpush1.bf16.msra.mxu0 %v1816_v50 }
 0x16d   :  { %1310 = vmatprep.subr.bf16.mxu0 %v1821_v51 }
 0x170   :  { %1311 = vmatpush1.bf16.msra.mxu0 %v1819_v52 }
 0x171   :  { %1312 = vmatprep.subr.bf16.mxu0 %v1824_v53 }
 0x174   :  { %1313 = vmatpush1.bf16.msra.mxu0 %v1822_v54 }
 0x175   :  { %1314 = vmatprep.subr.bf16.mxu0 %v1827_v55 }
 0x178   :  { %1315 = vmatpush1.bf16.msra.mxu0 %v1825_v56 }
 0x179   :  { %1316 = vmatprep.subr.bf16.mxu0 %v1830_v57 }
 0x17c   :  { %1317 = vmatpush1.bf16.msra.mxu0 %v1828_v59 }
 0x17d   :  { %1318 = vmatprep.subr.bf16.mxu0 %v1833_v60 }
 0x180   :  { %1319 = vmatpush1.bf16.msra.mxu0 %v1831_v61 }
 0x181   :  { %1320 = vmatprep.subr.bf16.mxu0 %v1836_v62 }
 0x184   :  { %1321 = vmatpush1.bf16.msra.mxu0 %v1834_v63 }
 0x185   :  { %1322 = vmatprep.subr.bf16.mxu0 %v1839_v1 }
 0x188   :  { %1323 = vmatpush1.bf16.msra.mxu0 %v1837_v2 }
 0x189   :  { %1324 = vmatprep.subr.bf16.mxu0 %v1842_v58 }
 0x18c   :  { %1325 = vmatpush1.bf16.msra.mxu0 %v1840_v3  ;;  %v1386_v3 = vand.u32 127, %v177_v17 }
 0x18d   :  { %1326 = vmatprep.subr.bf16.mxu0 %v1845_v4 }
 0x18e   :  { %v1391_v4 = vadd.s32 4294967288, %v1386_v3 }
 0x190   :  { %1327 = vmatpush1.bf16.msra.mxu0 %v1843_v0  ;;  %v1389_v0 = vsub.s32 %v1386_v3, %v2052_v18 }
 0x191   :  { %1328 = vmatprep.subr.bf16.mxu0 %v1848_v5  ;;  %v1394_v5 = vsub.s32 %v1391_v4, %v2052_v18 }
 0x194   :  { %1329 = vmatpush1.bf16.msra.mxu0 %v1846_v6 }
 0x195   :  { %1330 = vmatprep.subr.bf16.mxu0 %v1851_v7 }
 0x198   :  { %1331 = vmatpush1.bf16.msra.mxu0 %v1849_v8 }
 0x1ae   :  { %v840_v13 = vpop.f32.mrb[4].mxu1 }
 0x1af   :  { %v1585_v14 = vadd.f32 %v840_v13, %v188_v11  ;;  %v842_v15 = vpop.f32.mrb[5].mxu1 }
 0x1b0   :  { %v1586_v16 = vadd.f32 %v842_v15, %v192_v12  ;;  %v844_v21 = vpop.f32.mrb[6].mxu1 }
 0x1b1   :  { %v1587_v22 = vadd.f32 %v844_v21, %v188_v11  ;;  %v846_v23 = vpop.f32.mrb[7].mxu1  ;;  %v851_v25 = vmax.f32 %v1585_v14, 0.0 }
 0x1b2   :  { %v1588_v24 = vadd.f32 %v846_v23, %v192_v12  ;;  %v852_v27 = vmax.f32 %v1586_v16, 0.0 }
 0x1b3   :  { %v855_v26 = vmax.f32 %v1587_v22, 0.0 }
 0x1b4   :  { %v856_v28 = vmax.f32 %v1588_v24, 0.0 }
 0x1b5   :  { %v859_v29 = vpack.c.bf16 %v855_v26, %v851_v25 }
 0x1b6   :  { %v860_v30 = vpack.c.bf16 %v856_v28, %v852_v27 }
 0x1b8   :  { %1332 = vmatprep.mubr.bf16.mxu0 %v860_v30 }
 0x1b9   :  { %1333 = vmatmul.mubr.bf16.vlgmr.msra.gmra.mrb[4].mxu0 %v859_v29 }
 0x28c   :  { %v1334_v34 = vpop.f32.mrb[4].mxu0 }
 0x28d   :  { %v1589_v35 = vadd.f32 %v1334_v34, %v930_v31  ;;  %v1336_v36 = vpop.f32.mrb[5].mxu0 }
 0x28e   :  { %v1590_v38 = vadd.f32 %v1336_v36, %v934_v32  ;;  %v1338_v39 = vpop.f32.mrb[6].mxu0 }
 0x28f   :  { %v1343_v41 = vmax.f32 %v1589_v35, 0.0  ;;  %v1591_v42 = vadd.f32 %v1338_v39, %v930_v31  ;;  %v1340_v43 = vpop.f32.mrb[7].mxu0 }
 0x290   :  { %v1344_v44 = vmax.f32 %v1590_v38, 0.0  ;;  %v1592_v46 = vadd.f32 %v1340_v43, %v934_v32 }
 0x291   :  { %v1345_v47 = vmax.f32 %v1591_v42, 0.0  ;;  %v1359_v48 = vmul.f32 %v1352_v37, %v1343_v41 }
 0x292   :  { %v1346_v49 = vmax.f32 %v1592_v46, 0.0  ;;  %v1360_v50 = vmul.f32 %v1356_v40, %v1344_v44 }
 0x293   :  { %v1361_v51 = vmul.f32 %v1352_v37, %v1345_v47 }
 0x294   :  { %v1362_v52 = vmul.f32 %v1356_v40, %v1346_v49  ;;  %v1363_v53 = vadd.f32 %v1360_v50, %v1359_v48 }
 0x296   :  { %1364 = vadd.xlane.f32.xlu0 %v1363_v53  ;;  %v1366_v54 = vadd.f32 %v1362_v52, %v1361_v51 }
 0x29a   :  { %1367 = vadd.xlane.f32.xlu0 %v1366_v54 }
 0x323   :  { %v1365_v45 = vpop.xlane.xlu0 %1364 }
 0x324   :  { %v1371_v55 = vadd.f32 %v1370_v19, %v1365_v45 }
 0x326   :  { %v1373_v56 = vsub.f32 0.0, %v1371_v55 }
 0x327   :  { %v1368_v57 = vpop.xlane.xlu0 %1367 }
 0x328   :  { %v1375_v59 = vmul.f32 1.442695, %v1373_v56  ;;  %v1372_v60 = vadd.f32 %v1370_v19, %v1368_v57 }
 0x32a   :  { %1852 = vpow2.f32 %v1375_v59  ;;  %v1374_v61 = vsub.f32 0.0, %v1372_v60 }
 0x32c   :  { %v1377_v62 = vmul.f32 1.442695, %v1374_v61 }
 0x32e   :  { %1854 = vpow2.f32 %v1377_v62 }
 0x334   :  { %v1853_v63 = vpop.eup %1852 }
 0x335   :  { %v1379_v1 = vadd.f32 1.0, %v1853_v63 }
 0x337   :  { %1856 = vrcp.f32 %v1379_v1 }
 0x338   :  { %v1855_v2 = vpop.eup %1854 }
 0x339   :  { %v1380_v58 = vadd.f32 1.0, %v1855_v2 }
 0x33b   :  { %1858 = vrcp.f32 %v1380_v58 }
 0x341   :  { %v1857_v6 = vpop.eup %1856 }
 0x342   :  { %v1390_v8 = vrot.slane %v1857_v6, %v1389_v0 }
 0x345   :  { %v1859_v7 = vpop.eup %1858 }
 0x346   :  { %v1395_v9 = vrot.slane %v1859_v7, %v1394_v5 }
 0x348   :  { %v1397_v10 = vsel %vm1396_vm0, %v1395_v9, %v1390_v8 }
 0x349   :  { %1400 = vst.msk [vmem:[#allocation9] sm:$0x1] %vm1399_vm1, %v1397_v10 }
 0x34a   :  { %1937 = shalt.err (!%p1934_p0)
}
 0x34b   :  { %s1938_s27 = scalar_lea.hbm %s2108_s7, 16 }
 0x34c   :  { %p1939_p1 = scmp.ne.s32.totalorder %s2108_s7, %s1938_s27  ;;  %p1942_p2 = scmp.lt.u32.totalorder %s1938_s27, %s2108_s7 }
 0x34e   :  { %p1944_p3 = pnand %p1942_p2, %p1939_p1 }
 0x350   :  { %1947 = shalt.err (!%p1944_p3)
}
 0x351   :  { %1410 = dma.vmem_to_hbm [thread:$0]  %s1408_s23, 16, %s2108_s7, [#allocation5]  }
 0x352   :  { %1952 = dma.done.wait [#allocation5], 16  }
 0x353   :  { %1953 = vsyncadd [#allocation5], 4294967280 }
 0x354   :  { %1414 = vsyncpa [#allocation4], 1 }
 0x355   :  { %1415 = vsyncpa [#allocation7], 1 }
 0x356   :  { %1416 = vsyncpa [#allocation5], 1 }

</bundles_post_ra>
